<compile_context>
chip_gen: v6e
topology: v6e:2x2x1
jax: 0.10.0
libtpu: 0.0.40
codegen_flags: <defaults>
</compile_context>

<pallas_src>
import jax
import jax.numpy as jnp
from jax.experimental import pallas as pl
from jax.experimental.pallas import tpu as pltpu

LN_EPS = 1e-6  # eps of the OpenNMT-style LayerNorm


def _round_up(n, m):
    return ((n + m - 1) // m) * m


def _make_ffn_kernel(n_col, tn):
    """Kernel factory: n_col / tn are compile-time constants closed over by the body."""

    def kernel(x_ref, w_ref, b_ref, g_ref, beta_ref, o_ref, y_ref):
        # x_ref:   (RT, D)   input rows (resident across the column sweep, index invariant in j)
        # w_ref:   (D, TN)   pre-transposed bf16 weight column tile
        # b_ref:   (1, TN)   bias slice (f32)
        # g_ref:   (1, D)    LN gamma (f32)
        # beta_ref:(1, D)    LN beta  (f32)
        # o_ref:   (RT, TN)  output tile
        # y_ref:   (RT, D)   bf16 scratch holding LayerNorm(x) for this row tile
        j = pl.program_id(1)

        # --- LayerNorm once per row tile (two-pass stats, f32 math) -----------------
        @pl.when(j == 0)
        def _():
            x = x_ref[...].astype(jnp.float32)
            mean = jnp.mean(x, axis=-1, keepdims=True)
            xc = x - mean
            var = jnp.mean(xc * xc, axis=-1, keepdims=True)
            inv = jax.lax.rsqrt(var + LN_EPS)
            y_ref[...] = (xc * inv * g_ref[...] + beta_ref[...]).astype(y_ref.dtype)

        # --- Linear column tile: h = LN(x) @ W[:, j*TN:(j+1)*TN] + b  (bf16 MXU, f32 acc)
        h = jnp.dot(y_ref[...], w_ref[...], preferred_element_type=jnp.float32)

        # --- ReLU --------------------------------------------------------------------
        h = jnp.maximum(h + b_ref[...], 0.0)

        # TODO(synk): dropout omitted (inference-mode identity); training-mode dropout would
        # need pltpu.prng_seed/prng_random_bits and a 1/(1-p) rescale.

        # --- Residual add: re-read the resident x block (short f32 live range) --------
        if n_col == 1:
            x_res = x_ref[...]
        else:
            c0 = pl.multiple_of(j * tn, 128)
            x_res = x_ref[:, pl.ds(c0, tn)]
        o_ref[...] = (h + x_res.astype(jnp.float32)).astype(o_ref.dtype)

    return kernel


def prepare_ffn_weight(weight):
    """One-time init-path prep: torch-layout (out, in) weight -> (in, out) bf16."""
    return jnp.asarray(weight).T.astype(jnp.bfloat16)


def feed_forward(x, w_in_out, bias, gamma, beta, *, row_tile=None):
    """Fused forward of FeedForward (eval mode).

    x:        (B, S, D)
    w_in_out: (D, D) weight, pre-transposed to (in, out) and pre-cast to bf16
              (use `prepare_ffn_weight` once at init).
    bias / gamma / beta: (D,)
    """
    B, S, D = x.shape
    rows = B * S
    x2d = x.reshape(rows, D)

    in_size = jnp.dtype(x.dtype).itemsize
    out_size = in_size
    sub = 8 if in_size >= 4 else (16 if in_size == 2 else 32)

    # Adaptive row tile: large tiles in the HBM-bound (small D) regime, 256 for large D.
    if row_tile is None:
        row_tile = 512 if D <= 2048 else 256
    rt = min(_round_up(row_tile, sub), _round_up(rows, sub))
    rows_p = _round_up(rows, rt)
    if rows_p != rows:
        x2d = jnp.pad(x2d, ((0, rows_p - rows), (0, 0)))

    # --- Per-generation VMEM budget -------------------------------------------------
    try:
        vmem_physical = int(pltpu.get_tpu_info().vmem_capacity_bytes)
    except Exception:
        vmem_physical = 128 * 1024 * 1024  # v5e/v6e default; v7x is 64 MiB
    budget = int(0.80 * vmem_physical)  # headroom for Mosaic internal scratch / spills

    def vmem_est(tn):
        return (2 * D * tn * 2          # weight column tile (bf16, double-buffered by the pipeline)
                + 2 * rt * D * in_size  # x row tile (double-buffered)
                + 2 * rt * tn * out_size  # output tile (double-buffered)
                + rt * D * 2            # LN scratch (bf16)
                + 2 * 2 * D * 4         # gamma / beta (double-buffered f32)
                + 2 * tn * 4)           # bias slice

    # Column-tile the weight's output dim only when full-width tiles don't fit.
    tn = D
    if vmem_est(D) > budget and D % 128 == 0:
        cand = [t for t in range(128, D + 1, 128) if D % t == 0 and vmem_est(t) <= budget]
        tn = cand[-1] if cand else 128
    n_col = D // tn

    est = vmem_est(tn)
    vmem_limit = int(min(max(int(1.2 * est) + (4 << 20), 32 << 20),
                         int(0.9 * vmem_physical)))

    kernel = _make_ffn_kernel(n_col, tn)

    b2d = bias.reshape(1, D).astype(jnp.float32)
    g2d = gamma.reshape(1, D).astype(jnp.float32)
    beta2d = beta.reshape(1, D).astype(jnp.float32)

    out2d = pl.pallas_call(
        kernel,
        out_shape=jax.ShapeDtypeStruct((rows_p, D), x.dtype),
        grid_spec=pltpu.PrefetchScalarGridSpec(
            num_scalar_prefetch=0,
            grid=(rows_p // rt, n_col),
            in_specs=[
                pl.BlockSpec((rt, D), lambda i, j: (i, 0)),   # x rows (resident across j)
                pl.BlockSpec((D, tn), lambda i, j: (0, j)),   # weight (in, out) bf16 column tile
                pl.BlockSpec((1, tn), lambda i, j: (0, j)),   # bias slice
                pl.BlockSpec((1, D), lambda i, j: (0, 0)),    # LN gamma
                pl.BlockSpec((1, D), lambda i, j: (0, 0)),    # LN beta
            ],
            out_specs=pl.BlockSpec((rt, tn), lambda i, j: (i, j)),
            scratch_shapes=[pltpu.VMEM((rt, D), jnp.bfloat16)],  # LN(x) cache for the row tile
        ),
        compiler_params=pltpu.CompilerParams(
            # TODO(synk): on v7x, verify in xprof that the row axis really splits across both
            # TensorCores; if not, switch to pltpu.CORE_PARALLEL on that axis.
            dimension_semantics=("parallel", "arbitrary"),
            vmem_limit_bytes=vmem_limit,
        ),
    )(x2d, w_in_out, b2d, g2d, beta2d)

    if rows_p != rows:
        out2d = out2d[:rows]
    return out2d.reshape(B, S, D)


def _reference(x, weight, bias, gamma, beta):
    # Pure f32 reference of the module's forward (dropout = identity), torch-layout weight.
    xf = x.astype(jnp.float32)
    mean = jnp.mean(xf, axis=-1, keepdims=True)
    var = jnp.mean((xf - mean) ** 2, axis=-1, keepdims=True)
    y = (xf - mean) / jnp.sqrt(var + LN_EPS) * gamma + beta
    h = jnp.maximum(y @ weight.T + bias, 0.0)
    return (h + xf).astype(x.dtype)


if __name__ == "__main__":
    key = jax.random.PRNGKey(0)
    B, S, D = 2, 8, 32  # batch=2, seq=8, d_model=32 (small self-test shape)

    k_x, k_w, k_b, k_g, k_be = jax.random.split(key, 5)
    x = jax.random.normal(k_x, (B, S, D), dtype=jnp.float32)
    weight = jax.random.normal(k_w, (D, D), dtype=jnp.float32) * (1.0 / jnp.sqrt(D))
    bias = jax.random.normal(k_b, (D,), dtype=jnp.float32) * 0.1
    gamma = 1.0 + 0.1 * jax.random.normal(k_g, (D,), dtype=jnp.float32)
    beta = 0.1 * jax.random.normal(k_be, (D,), dtype=jnp.float32)

    # Init-path weight prep (done once, outside the hot path).
    w_in_out = prepare_ffn_weight(weight)

    out = feed_forward(x, w_in_out, bias, gamma, beta)
    jax.block_until_ready(out)

    ref = _reference(x, weight, bias, gamma, beta)
    # Tolerance accounts for the bf16 MXU matmul / bf16 LN cache vs. the f32 reference.
    assert jnp.allclose(out, ref, atol=3e-2, rtol=3e-2), "mismatch vs reference"

    print("KERNEL_OK")
</pallas_src>

<mosaic_0001>
module attributes {stable_mosaic.version = 11 : i64} {
  func.func @kernel(%arg0: i32, %arg1: i32, %arg2: memref<16x32xf32, #tpu.memory_space<vmem>>, %arg3: memref<32x32xbf16, #tpu.memory_space<vmem>>, %arg4: memref<1x32xf32, #tpu.memory_space<vmem>>, %arg5: memref<1x32xf32, #tpu.memory_space<vmem>>, %arg6: memref<1x32xf32, #tpu.memory_space<vmem>>, %arg7: memref<16x32xf32, #tpu.memory_space<vmem>>, %arg8: memref<16x32xbf16, #tpu.memory_space<vmem>>) attributes {dimension_semantics = [#tpu.dimension_semantics<parallel>, #tpu.dimension_semantics<arbitrary>], iteration_bounds = array<i64: 1, 1>, scalar_prefetch = 0 : i64, scratch_operands = 1 : i64, tpu.core_type = #tpu.core_type<tc>, window_params = [{transform_indices = @transform_0, window_bounds = array<i64: 16, 32>}, {transform_indices = @transform_1, window_bounds = array<i64: 32, 32>}, {transform_indices = @transform_2, window_bounds = array<i64: 1, 32>}, {pipeline_mode = #tpu.pipeline_mode<synchronous>, transform_indices = @transform_3, window_bounds = array<i64: 1, 32>}, {pipeline_mode = #tpu.pipeline_mode<synchronous>, transform_indices = @transform_4, window_bounds = array<i64: 1, 32>}, {transform_indices = @transform_5, window_bounds = array<i64: 16, 32>}]} {
    %c0_i32 = arith.constant 0 : i32
    %0 = arith.cmpi eq, %arg1, %c0_i32 : i32
    %1 = arith.extui %0 : i1 to i32
    %c0_i32_0 = arith.constant 0 : i32
    %2 = arith.cmpi ne, %1, %c0_i32_0 : i32
    scf.if %2 {
      %c0_11 = arith.constant 0 : index
      %c0_12 = arith.constant 0 : index
      %14 = vector.load %arg2[%c0_11, %c0_12] : memref<16x32xf32, #tpu.memory_space<vmem>>, vector<16x32xf32>
      %cst_13 = arith.constant dense<0.000000e+00> : vector<16xf32>
      %15 = vector.multi_reduction <add>, %14, %cst_13 [1] : vector<16x32xf32> to vector<16xf32>
      %16 = vector.shape_cast %15 : vector<16xf32> to vector<16x1xf32>
      %cst_14 = arith.constant 3.200000e+01 : f32
      %17 = vector.broadcast %cst_14 : f32 to vector<16x1xf32>
      %18 = arith.divf %16, %17 : vector<16x1xf32>
      %19 = vector.broadcast %18 : vector<16x1xf32> to vector<16x32xf32>
      %20 = arith.subf %14, %19 : vector<16x32xf32>
      %21 = arith.mulf %20, %20 : vector<16x32xf32>
      %cst_15 = arith.constant dense<0.000000e+00> : vector<16xf32>
      %22 = vector.multi_reduction <add>, %21, %cst_15 [1] : vector<16x32xf32> to vector<16xf32>
      %23 = vector.shape_cast %22 : vector<16xf32> to vector<16x1xf32>
      %cst_16 = arith.constant 3.200000e+01 : f32
      %24 = vector.broadcast %cst_16 : f32 to vector<16x1xf32>
      %25 = arith.divf %23, %24 : vector<16x1xf32>
      %cst_17 = arith.constant 9.99999997E-7 : f32
      %26 = vector.broadcast %cst_17 : f32 to vector<16x1xf32>
      %27 = arith.addf %25, %26 : vector<16x1xf32>
      %28 = math.rsqrt %27 : vector<16x1xf32>
      %29 = vector.broadcast %28 : vector<16x1xf32> to vector<16x32xf32>
      %30 = arith.mulf %20, %29 : vector<16x32xf32>
      %c0_18 = arith.constant 0 : index
      %c0_19 = arith.constant 0 : index
      %31 = vector.load %arg5[%c0_18, %c0_19] : memref<1x32xf32, #tpu.memory_space<vmem>>, vector<1x32xf32>
      %32 = vector.broadcast %31 : vector<1x32xf32> to vector<16x32xf32>
      %33 = arith.mulf %30, %32 : vector<16x32xf32>
      %c0_20 = arith.constant 0 : index
      %c0_21 = arith.constant 0 : index
      %34 = vector.load %arg6[%c0_20, %c0_21] : memref<1x32xf32, #tpu.memory_space<vmem>>, vector<1x32xf32>
      %35 = vector.broadcast %34 : vector<1x32xf32> to vector<16x32xf32>
      %36 = arith.addf %33, %35 : vector<16x32xf32>
      %37 = arith.truncf %36 : vector<16x32xf32> to vector<16x32xbf16>
      %c0_22 = arith.constant 0 : index
      %c0_23 = arith.constant 0 : index
      %38 = vector.load %arg8[%c0_22, %c0_23] : memref<16x32xbf16, #tpu.memory_space<vmem>>, vector<16x32xbf16>
      tpu.vector_store %arg8[%c0_22, %c0_23], %37 {strides = array<i32>} : memref<16x32xbf16, #tpu.memory_space<vmem>>, vector<16x32xbf16>,
    } else {
    }
    %c0 = arith.constant 0 : index
    %c0_1 = arith.constant 0 : index
    %3 = vector.load %arg8[%c0, %c0_1] : memref<16x32xbf16, #tpu.memory_space<vmem>>, vector<16x32xbf16>
    %c0_2 = arith.constant 0 : index
    %c0_3 = arith.constant 0 : index
    %4 = vector.load %arg3[%c0_2, %c0_3] : memref<32x32xbf16, #tpu.memory_space<vmem>>, vector<32x32xbf16>
    %cst = arith.constant dense<0.000000e+00> : vector<16x32xf32>
    %5 = tpu.matmul %3, %4, %cst {dimension_numbers = #tpu.dot_dimension_numbers<[1], [0], [0], [1], [0, 0, 1, 1], [], []>} : vector<16x32xbf16>, vector<32x32xbf16>, vector<16x32xf32> -> vector<16x32xf32>
    %c0_4 = arith.constant 0 : index
    %c0_5 = arith.constant 0 : index
    %6 = vector.load %arg4[%c0_4, %c0_5] : memref<1x32xf32, #tpu.memory_space<vmem>>, vector<1x32xf32>
    %7 = vector.broadcast %6 : vector<1x32xf32> to vector<16x32xf32>
    %8 = arith.addf %5, %7 : vector<16x32xf32>
    %cst_6 = arith.constant 0.000000e+00 : f32
    %9 = vector.broadcast %cst_6 : f32 to vector<16x32xf32>
    %10 = arith.maximumf %8, %9 : vector<16x32xf32>
    %c0_7 = arith.constant 0 : index
    %c0_8 = arith.constant 0 : index
    %11 = vector.load %arg2[%c0_7, %c0_8] : memref<16x32xf32, #tpu.memory_space<vmem>>, vector<16x32xf32>
    %12 = arith.addf %10, %11 : vector<16x32xf32>
    %c0_9 = arith.constant 0 : index
    %c0_10 = arith.constant 0 : index
    %13 = vector.load %arg7[%c0_9, %c0_10] : memref<16x32xf32, #tpu.memory_space<vmem>>, vector<16x32xf32>
    tpu.vector_store %arg7[%c0_9, %c0_10], %12 {strides = array<i32>} : memref<16x32xf32, #tpu.memory_space<vmem>>, vector<16x32xf32>,
    return
  }
  func.func @transform_0(%arg0: i32, %arg1: i32) -> (i32, i32) {
    %c0_i32 = arith.constant 0 : i32
    %c0_i32_0 = arith.constant 0 : i32
    return %arg0, %c0_i32 : i32, i32
  }
  func.func @transform_1(%arg0: i32, %arg1: i32) -> (i32, i32) {
    %c0_i32 = arith.constant 0 : i32
    %c0_i32_0 = arith.constant 0 : i32
    return %c0_i32, %arg1 : i32, i32
  }
  func.func @transform_2(%arg0: i32, %arg1: i32) -> (i32, i32) {
    %c0_i32 = arith.constant 0 : i32
    %c0_i32_0 = arith.constant 0 : i32
    return %c0_i32, %arg1 : i32, i32
  }
  func.func @transform_3(%arg0: i32, %arg1: i32) -> (i32, i32) {
    %c0_i32 = arith.constant 0 : i32
    %c0_i32_0 = arith.constant 0 : i32
    %c0_i32_1 = arith.constant 0 : i32
    return %c0_i32, %c0_i32_0 : i32, i32
  }
  func.func @transform_4(%arg0: i32, %arg1: i32) -> (i32, i32) {
    %c0_i32 = arith.constant 0 : i32
    %c0_i32_0 = arith.constant 0 : i32
    %c0_i32_1 = arith.constant 0 : i32
    return %c0_i32, %c0_i32_0 : i32, i32
  }
  func.func @transform_5(%arg0: i32, %arg1: i32) -> (i32, i32) {
    %c0_i32 = arith.constant 0 : i32
    return %arg0, %arg1 : i32, i32
  }
}

</mosaic_0001>

<bundles_post_ra>
// kernel: tpu_custom_call.1
= control target key start
LH: loop header
LB: loop body
LE: loop exit
PB: predicated region body
PF: predicated region fallthrough
CT: control target
= control target key end

     0   :  { %10 = vsyncpa [#allocation4], 0  ;;  %s393_s0 = inlined_call_operand.hbm [shape: f32[16,32], index: 0, kind: input, shape index: {}]   ;;  %s394_s1 = inlined_call_operand.hbm [shape: bf16[32,32], index: 1, kind: input, shape index: {}]   ;;  %s395_s2 = inlined_call_operand.vmem [shape: f32[1,32], index: 2, kind: input, shape index: {}]   ;;  %s396_s3 = inlined_call_operand.vmem [shape: f32[1,32], index: 3, kind: input, shape index: {}]   ;;  %s397_s4 = inlined_call_operand.vmem [shape: f32[1,32], index: 4, kind: input, shape index: {}]   ;;  %s398_s5 = inlined_call_operand.hbm [shape: f32[16,32], index: 5, kind: output, shape index: {}]  }
   0x1   :  { %11 = vsyncpa [#allocation7], 0 }
   0x2   :  { %12 = vsyncpa [#allocation5], 0  ;;  %s318_s18 = smov [#allocation3]  }
   0x3   :  { %s18_s19 = sshll.u32 %s318_s18, 4  ;;  %s19_s19 = int_to_ptr.vmem [resolvable:$true] %s18_s19 }
   0x4   :  { %s260_s20 = scalar_lea.vmem %s19_s19, 256  ;;  %p265_p1 = scmp.lt.s32.totalorder %s19_s19, %s19_s19 }
   0x5   :  { %p261_p0 = scmp.ne.s32.totalorder %s19_s19, %s260_s20  ;;  %p266_p2 = scmp.lt.s32.totalorder %s260_s20, %s260_s20 }
   0x7   :  { %p267_p3 = por %p266_p2, %p265_p1 }
   0x9   :  { %p268_p4 = pnand %p267_p3, %p261_p0 }
   0xb   :  { %271 = shalt.err (!%p268_p4)
}
   0xc   :  { %s319_s21 = smov 128   ;;  %s320_s22 = smov 8  }
   0xd   :  { %24 = dma.hbm_to_vmem [thread:$0]  %s393_s0, 256, %s19_s19, [#allocation4], %s319_s21, %s319_s21, %s320_s22  }
   0xe   :  { %s321_s25 = smov [#allocation6]  }
   0xf   :  { %s30_s26 = sshll.u32 %s321_s25, 4  ;;  %s31_s26 = int_to_ptr.vmem [resolvable:$true] %s30_s26 }
  0x10   :  { %s280_s27 = scalar_lea.vmem %s31_s26, 256  ;;  %p285_p6 = scmp.lt.s32.totalorder %s31_s26, %s31_s26 }
  0x11   :  { %p281_p5 = scmp.ne.s32.totalorder %s31_s26, %s280_s27  ;;  %p286_p7 = scmp.lt.s32.totalorder %s280_s27, %s280_s27 }
  0x13   :  { %p287_p8 = por %p286_p7, %p285_p6 }
  0x15   :  { %p288_p9 = pnand %p287_p8, %p281_p5 }
  0x17   :  { %291 = shalt.err (!%p288_p9)
}
  0x18   :  { %s322_s28 = smov 64   ;;  %s323_s29 = smov 4  }
  0x19   :  { %36 = dma.hbm_to_vmem [thread:$0]  %s394_s1, 256, %s31_s26, [#allocation7], %s322_s28, %s322_s28, %s323_s29  }
  0x1a   :  { %312 = dma.done.wait [#allocation4], 256  }
  0x1b   :  { %313 = vsyncadd [#allocation4], 4294967040 }
  0x1c   :  { %314 = dma.done.wait [#allocation7], 256  }
  0x1d   :  { %315 = vsyncadd [#allocation7], 4294967040  ;;  %vm56_vm0 = vcmask 261120   ;;  %v54_v0 = vld [vmem:[#allocation3] sm:$0xff]  ;;  %v366_v1 = vld [vmem:[#allocation3 + $0x8] sm:$0xff]  ;;  %v324_v15 = vmov 0.0  }
  0x1e   :  { %v57_v2 = vsel %vm56_vm0, %v54_v0, 0.0  ;;  %v60_v3 = vsel %vm56_vm0, %v366_v1, 0.0  ;;  %v245_v14 = vld [vmem:[#allocation6 + $0x8] sm:$0xff]   ;;  %228 = vmatprep.subr.bf16.mxu0 %v324_v15  ;;  %vm325_vm1 = vmmov 0   ;;  %v246_v16 = vld [vmem:[#allocation6] sm:$0xff]   ;;  %vm110_vm2 = vcmask 257024  }
  0x1f   :  { %58 = vadd.xlane.f32.xlu0 %v57_v2  ;;  %232 = vmatprep.mubr.msk.bf16.mxu0 %vm325_vm1, %v324_v15  ;;  %v214_v24 = vld [vmem:[%s396_s3] ss:$0 sm:$0xff] }
  0x20   :  { %229 = vmatpush3.bf16.msra.mxu0 %v245_v14  ;;  %v215_v26 = vld [vmem:[%s397_s4] ss:$0 sm:$0xff]  ;;  %s326_s4 = smov [#allocation8]  }
  0x21   :  { %230 = vmatprep.subr.bf16.mxu0 %v324_v15  ;;  %v218_v36 = vld [vmem:[%s395_s2] ss:$0 sm:$0xff]  ;;  %s201_s10 = sshll.u32 %s326_s4, 4  ;;  %s202_s10 = int_to_ptr.vmem [resolvable:$true] %s201_s10 }
  0x22   :  { %s292_s11 = scalar_lea.vmem %s202_s10, 256  ;;  %p297_p11 = scmp.lt.s32.totalorder %s202_s10, %s202_s10 }
  0x23   :  { %61 = vadd.xlane.f32.xlu0 %v60_v3  ;;  %p293_p10 = scmp.ne.s32.totalorder %s202_s10, %s292_s11  ;;  %p298_p12 = scmp.lt.s32.totalorder %s292_s11, %s292_s11 }
  0x24   :  { %231 = vmatpush3.bf16.msra.mxu0 %v246_v16 }
  0x25   :  { %p299_p13 = por %p298_p12, %p297_p11 }
  0x27   :  { %p300_p0 = pnand %p299_p13, %p293_p10 }
  0xa8   :  { %v59_v4 = vpop.xlane.xlu0 %58 }
  0xa9   :  { %v64_v5 = vmul.f32 0.03125, %v59_v4 }
  0xab   :  { %v66_v6 = vsub.f32 %v54_v0, %v64_v5 }
  0xac   :  { %v62_v7 = vpop.xlane.xlu0 %61 }
  0xad   :  { %v65_v8 = vmul.f32 0.03125, %v62_v7  ;;  %v68_v9 = vmul.f32 %v66_v6, %v66_v6 }
  0xaf   :  { %v67_v10 = vsub.f32 %v366_v1, %v65_v8  ;;  %v70_v11 = vsel %vm56_vm0, %v68_v9, 0.0 }
  0xb0   :  { %71 = vadd.xlane.f32.xlu1 %v70_v11 }
  0xb1   :  { %v69_v12 = vmul.f32 %v67_v10, %v67_v10 }
  0xb3   :  { %v73_v13 = vsel %vm56_vm0, %v69_v12, 0.0 }
  0xb4   :  { %74 = vadd.xlane.f32.xlu1 %v73_v13 }
 0x139   :  { %v72_v17 = vpop.xlane.xlu1 %71 }
 0x13a   :  { %v76_v18 = vmul.f32 0.03125, %v72_v17 }
 0x13c   :  { %v78_v19 = vadd.f32 1e-06, %v76_v18 }
 0x13d   :  { %v75_v20 = vpop.xlane.xlu1 %74 }
 0x13e   :  { %248 = vrsqrt.f32 %v78_v19  ;;  %v77_v21 = vmul.f32 0.03125, %v75_v20 }
 0x140   :  { %v79_v22 = vadd.f32 1e-06, %v77_v21 }
 0x142   :  { %250 = vrsqrt.f32 %v79_v22 }
 0x14b   :  { %v249_v23 = vpop.eup %248 }
 0x14c   :  { %v82_v25 = vmul.f32 %v249_v23, %v66_v6 }
 0x14e   :  { %v91_v27 = vmul.f32 %v214_v24, %v82_v25 }
 0x14f   :  { %v251_v28 = vpop.eup %250 }
 0x150   :  { %v100_v29 = vadd.f32 %v215_v26, %v91_v27  ;;  %v83_v30 = vmul.f32 %v251_v28, %v67_v10 }
 0x152   :  { %v223_v31 = vpack.c.bf16 %v100_v29, %v100_v29  ;;  %v92_v32 = vmul.f32 %v214_v24, %v83_v30 }
 0x154   :  { %111 = vst.msk [vmem:[#allocation2] sm:$0xf] %vm110_vm2, %v223_v31  ;;  %v101_v33 = vadd.f32 %v215_v26, %v92_v32 }
 0x156   :  { %v224_v34 = vpack.c.bf16 %v101_v33, %v101_v33 }
 0x158   :  { %112 = vst.msk [vmem:[#allocation2 + $0x4] sm:$0xf] %vm110_vm2, %v224_v34 }
 0x15f   :  { %v247_v35 = vld [vmem:[#allocation2] sm:$0xff]  }
 0x160   :  { %233 = vmatmul.mubr.msk.bf16.vlgmr.msra.gmra.mxu0 %vm56_vm0, %v247_v35 }
 0x220   :  { %v181_v37 = vpop.f32.mrf.mxu0 }
 0x221   :  { %v182_v38 = vadd.f32 %v218_v36, %v181_v37 }
 0x222   :  { %v234_v39 = vpop.f32.mrf.mxu0 }
 0x223   :  { %v188_v40 = vmax.f32 %v182_v38, 0.0 }
 0x224   :  { %v184_v41 = vpop.f32.mrf.mxu0 }
 0x225   :  { %v192_v42 = vadd.f32 %v188_v40, %v54_v0  ;;  %v185_v43 = vadd.f32 %v218_v36, %v184_v41 }
 0x226   :  { %v235_v44 = vpop.f32.mrf.mxu0 }
 0x227   :  { %194 = vst.msk [vmem:[#allocation8] sm:$0xff] %vm56_vm0, %v192_v42  ;;  %v189_v45 = vmax.f32 %v185_v43, 0.0 }
 0x229   :  { %v193_v46 = vadd.f32 %v189_v45, %v366_v1 }
 0x22b   :  { %195 = vst.msk [vmem:[#allocation8 + $0x8] sm:$0xff] %vm56_vm0, %v193_v46 }
 0x22c   :  { %303 = shalt.err (!%p300_p0)
}
 0x22d   :  { %207 = dma.vmem_to_hbm [thread:$0]  %s202_s10, 256, %s398_s5, [#allocation5], %s319_s21, %s319_s21, %s320_s22  }
 0x22e   :  { %316 = dma.done.wait [#allocation5], 256  }
 0x22f   :  { %317 = vsyncadd [#allocation5], 4294967040 }
 0x230   :  { %211 = vsyncpa [#allocation4], 1 }
 0x231   :  { %212 = vsyncpa [#allocation7], 1 }
 0x232   :  { %213 = vsyncpa [#allocation5], 1 }

</bundles_post_ra>
